<compile_context>
chip_gen: v7x
topology: tpu7x:2x2x1
jax: 0.10.0
libtpu: 0.0.40
codegen_flags: <defaults>
</compile_context>

<pallas_src>
import jax
import jax.numpy as jnp
from jax.experimental import pallas as pl
from jax.experimental.pallas import tpu as pltpu

N_H = 4
FC_HIDDEN_DIMS = [8, 16, 32]
OUTPUT_DIM = 45
BN_EPS = 1e-5

LANE = 128
FC_DIMS = [N_H] + list(FC_HIDDEN_DIMS) + [OUTPUT_DIM]    # [4, 8, 16, 32, 45]
N_LAYERS = len(FC_DIMS) - 1                              # 4 linear layers
N_HIDDEN = N_LAYERS - 1                                  # 3 hidden blocks


def _round8(n):
    return ((n + 7) // 8) * 8


# Row-tight weight slab layout: layer i occupies ROW_PAD[i] rows starting at
# ROW_OFF[i]; padded rows / columns beyond (in_dim, out_dim) are zero.
ROW_PAD = [_round8(FC_DIMS[i]) for i in range(N_LAYERS)]   # [8, 8, 16, 32]
ROW_OFF = [sum(ROW_PAD[:i]) for i in range(N_LAYERS)]      # [0, 8, 16, 32]
W_ROWS = sum(ROW_PAD)                                      # 64

# Vector-slab rows: hidden layer i -> rows 3i (bias), 3i+1 (gamma), 3i+2 (beta);
# final-layer bias -> row 3*N_HIDDEN. Padded to a multiple of 8 sublanes.
VEC_ROWS = 3 * N_HIDDEN + 1                                # 10
VEC_ROWS_PAD = _round8(VEC_ROWS)                           # 16


def decoder_kernel(x_ref, w_ref, v_ref, out_ref):
    # x_ref:   (1, B, 4)    f32 — one decoder invocation (= one BN batch)
    # w_ref:   (64, 128)    f32 row-tight packed weight slab (VMEM-resident)
    # v_ref:   (16, 128)    f32 packed bias/gamma/beta rows (VMEM-resident)
    # out_ref: (1, B, 128)  f32 lane-dense output (cols >= 45 are zero)
    x = x_ref[0]                                   # (B, 4)
    k = N_H                                        # contraction width this layer

    for i in range(N_HIDDEN):
        off = ROW_OFF[i]
        w = w_ref[off:off + k, :]                  # (k, 128) static slice
        b = v_ref[3 * i:3 * i + 1, :]              # (1, 128)
        g = v_ref[3 * i + 1:3 * i + 2, :]          # (1, 128)
        be = v_ref[3 * i + 2:3 * i + 3, :]         # (1, 128)

        # Linear + ReLU
        h = jnp.dot(x, w, preferred_element_type=jnp.float32) + b
        h = jnp.maximum(h, 0.0)                    # (B, 128)

        # BatchNorm1d (training-mode forward), two-pass variance for precision.
        mean = jnp.mean(h, axis=0, keepdims=True)                  # (1, 128)
        c = h - mean
        var = jnp.mean(c * c, axis=0, keepdims=True)               # (1, 128)
        scale = g * jax.lax.rsqrt(var + BN_EPS)                    # (1, 128)
        xf = c * scale + be                                        # (B, 128)
        # padded lanes: h=0 -> mean=var=0, g=be=0 -> stay exactly 0

        # Next layer contracts only its (8-padded) in_dim lanes; lanes beyond
        # this layer's out_dim are exactly zero, so the slice loses nothing.
        k = ROW_PAD[i + 1]
        x = xf[:, :k]

    # Final linear (no activation / norm), lane-dense 128-wide store.
    off = ROW_OFF[N_HIDDEN]
    w = w_ref[off:off + k, :]
    b = v_ref[3 * N_HIDDEN:3 * N_HIDDEN + 1, :]
    out_ref[0] = (jnp.dot(x, w, preferred_element_type=jnp.float32) + b
                  ).astype(out_ref.dtype)


def pack_params(flat_params):
    """Pack the 14 small PyTorch-layout parameter arrays into a row-tight
    (64,128) weight slab and a (16,128) vector slab. Do this once; keep the
    slabs resident across calls."""
    w_slab = jnp.zeros((W_ROWS, LANE), jnp.float32)
    v_slab = jnp.zeros((VEC_ROWS_PAD, LANE), jnp.float32)
    idx = 0
    for i in range(N_LAYERS):
        in_dim, out_dim = FC_DIMS[i], FC_DIMS[i + 1]
        w = flat_params[idx]                       # (in_dim, out_dim)
        b = flat_params[idx + 1]                   # (1, out_dim)
        idx += 2
        off = ROW_OFF[i]
        w_slab = w_slab.at[off:off + in_dim, :out_dim].set(w)
        if i < N_HIDDEN:
            g, be = flat_params[idx], flat_params[idx + 1]
            idx += 2
            v_slab = v_slab.at[3 * i, :out_dim].set(b.reshape(-1))
            v_slab = v_slab.at[3 * i + 1, :out_dim].set(g.reshape(-1))
            v_slab = v_slab.at[3 * i + 2, :out_dim].set(be.reshape(-1))
        else:
            v_slab = v_slab.at[3 * N_HIDDEN, :out_dim].set(b.reshape(-1))
    return w_slab, v_slab


def decoder_forward(x, w_slab, v_slab, *, trim_output=True):
    """x: (B, 4) for a single decoder invocation, or (G, B, 4) for G stacked
    independent invocations (each group is its own BatchNorm batch). All G
    groups run in one pallas_call; the parameter slabs are DMA'd once."""
    squeeze_group = (x.ndim == 2)
    if squeeze_group:
        x = x[None]
    G, B, _ = x.shape

    out = pl.pallas_call(
        decoder_kernel,
        out_shape=jax.ShapeDtypeStruct((G, B, LANE), jnp.float32),
        grid_spec=pltpu.PrefetchScalarGridSpec(
            num_scalar_prefetch=0,
            grid=(G,),
            in_specs=[
                # per-group input block; full last dims so N_H=4 is legal
                pl.BlockSpec((1, B, N_H), lambda g: (g, 0, 0)),
                # constant block index -> slabs DMA'd once, VMEM-resident
                pl.BlockSpec((W_ROWS, LANE), lambda g: (0, 0)),
                pl.BlockSpec((VEC_ROWS_PAD, LANE), lambda g: (0, 0)),
            ],
            out_specs=pl.BlockSpec((1, B, LANE), lambda g: (g, 0, 0)),
        ),
        compiler_params=pltpu.CompilerParams(
            dimension_semantics=("parallel",)),   # groups independent -> 2 TCs on v7x
    )(x.astype(jnp.float32), w_slab, v_slab)

    if trim_output:
        out = out[..., :OUTPUT_DIM]
    if squeeze_group:
        out = out[0]
    return out


def init_params(key):
    """Deterministic PyTorch-style init: U(-1/sqrt(in), 1/sqrt(in)) for W, b;
    gamma=1, beta=0 for batchnorms."""
    flat = []
    for i in range(N_LAYERS):
        in_dim, out_dim = FC_DIMS[i], FC_DIMS[i + 1]
        key, kw, kb = jax.random.split(key, 3)
        bound = 1.0 / jnp.sqrt(jnp.float32(in_dim))
        w = jax.random.uniform(kw, (in_dim, out_dim), jnp.float32, -bound, bound)
        b = jax.random.uniform(kb, (1, out_dim), jnp.float32, -bound, bound)
        flat.append(w)
        flat.append(b)
        if i < N_HIDDEN:
            flat.append(jnp.ones((1, out_dim), jnp.float32))   # gamma
            flat.append(jnp.zeros((1, out_dim), jnp.float32))  # beta
    return flat


def reference_forward(x, flat_params):
    """Pure-JAX reference mirroring the PyTorch forward (training-mode BN)."""
    x = x.astype(jnp.float32)
    idx = 0
    for _ in range(N_HIDDEN):
        w, b, g, be = flat_params[idx:idx + 4]
        idx += 4
        h = jnp.maximum(
            jnp.dot(x, w, preferred_element_type=jnp.float32) + b, 0.0)
        mean = jnp.mean(h, axis=0, keepdims=True)
        var = jnp.mean((h - mean) ** 2, axis=0, keepdims=True)
        x = (h - mean) / jnp.sqrt(var + BN_EPS) * g + be
    w, b = flat_params[idx], flat_params[idx + 1]
    return jnp.dot(x, w, preferred_element_type=jnp.float32) + b


if __name__ == "__main__":
    key = jax.random.PRNGKey(0)
    key, kx, kp = jax.random.split(key, 3)

    n_groups = 4      # 4 independent decoder invocations, amortized in one call
    batch = 8         # each group is its own BatchNorm batch of 8
    x = jax.random.normal(kx, (n_groups, batch, N_H), jnp.float32)
    params = init_params(kp)

    # Pack once; slabs stay resident across repeated decoder calls.
    w_slab, v_slab = pack_params(params)

    out = decoder_forward(x, w_slab, v_slab)           # (4, 8, 45)
    out = jax.block_until_ready(out)
    assert out.shape == (n_groups, batch, OUTPUT_DIM), out.shape

    # Reference: each group is an independent BN batch.
    ref = jnp.stack([reference_forward(x[g], params) for g in range(n_groups)])
    assert jnp.allclose(out, ref, atol=2e-4, rtol=2e-4), (
        float(jnp.max(jnp.abs(out - ref))))

    print("KERNEL_OK")
</pallas_src>

<mosaic_0001>
module attributes {stable_mosaic.version = 11 : i64} {
  func.func @decoder_kernel(%arg0: i32, %arg1: memref<1x8x4xf32, #tpu.memory_space<vmem>>, %arg2: memref<64x128xf32, #tpu.memory_space<vmem>>, %arg3: memref<16x128xf32, #tpu.memory_space<vmem>>, %arg4: memref<1x8x128xf32, #tpu.memory_space<vmem>>) attributes {dimension_semantics = [#tpu.dimension_semantics<parallel>], iteration_bounds = array<i64: 4>, scalar_prefetch = 0 : i64, scratch_operands = 0 : i64, tpu.core_type = #tpu.core_type<tc>, window_params = [{transform_indices = @transform_0, window_bounds = array<i64: 1, 8, 4>}, {pipeline_mode = #tpu.pipeline_mode<synchronous>, transform_indices = @transform_1, window_bounds = array<i64: 64, 128>}, {pipeline_mode = #tpu.pipeline_mode<synchronous>, transform_indices = @transform_2, window_bounds = array<i64: 16, 128>}, {transform_indices = @transform_3, window_bounds = array<i64: 1, 8, 128>}]} {
    %c0 = arith.constant 0 : index
    %c0_0 = arith.constant 0 : index
    %c0_1 = arith.constant 0 : index
    %0 = vector.load %arg1[%c0, %c0_0, %c0_1] : memref<1x8x4xf32, #tpu.memory_space<vmem>>, vector<1x8x4xf32>
    %1 = vector.shape_cast %0 : vector<1x8x4xf32> to vector<8x4xf32>
    %c0_2 = arith.constant 0 : index
    %c0_3 = arith.constant 0 : index
    %2 = vector.load %arg2[%c0_2, %c0_3] : memref<64x128xf32, #tpu.memory_space<vmem>>, vector<4x128xf32>
    %c0_4 = arith.constant 0 : index
    %c0_5 = arith.constant 0 : index
    %3 = vector.load %arg3[%c0_4, %c0_5] : memref<16x128xf32, #tpu.memory_space<vmem>>, vector<1x128xf32>
    %c1 = arith.constant 1 : index
    %c0_6 = arith.constant 0 : index
    %4 = vector.load %arg3[%c1, %c0_6] : memref<16x128xf32, #tpu.memory_space<vmem>>, vector<1x128xf32>
    %c2 = arith.constant 2 : index
    %c0_7 = arith.constant 0 : index
    %5 = vector.load %arg3[%c2, %c0_7] : memref<16x128xf32, #tpu.memory_space<vmem>>, vector<1x128xf32>
    %cst = arith.constant dense<0.000000e+00> : vector<8x128xf32>
    %6 = tpu.matmul %1, %2, %cst {dimension_numbers = #tpu.dot_dimension_numbers<[1], [0], [0], [1], [0, 0, 1, 1], [], []>} : vector<8x4xf32>, vector<4x128xf32>, vector<8x128xf32> -> vector<8x128xf32>
    %7 = vector.broadcast %3 : vector<1x128xf32> to vector<8x128xf32>
    %8 = arith.addf %6, %7 : vector<8x128xf32>
    %cst_8 = arith.constant 0.000000e+00 : f32
    %9 = vector.broadcast %cst_8 : f32 to vector<8x128xf32>
    %10 = arith.maximumf %8, %9 : vector<8x128xf32>
    %cst_9 = arith.constant dense<0.000000e+00> : vector<128xf32>
    %11 = vector.multi_reduction <add>, %10, %cst_9 [0] : vector<8x128xf32> to vector<128xf32>
    %12 = vector.shape_cast %11 : vector<128xf32> to vector<1x128xf32>
    %cst_10 = arith.constant 8.000000e+00 : f32
    %13 = vector.broadcast %cst_10 : f32 to vector<1x128xf32>
    %14 = arith.divf %12, %13 : vector<1x128xf32>
    %15 = vector.broadcast %14 : vector<1x128xf32> to vector<8x128xf32>
    %16 = arith.subf %10, %15 : vector<8x128xf32>
    %17 = arith.mulf %16, %16 : vector<8x128xf32>
    %cst_11 = arith.constant dense<0.000000e+00> : vector<128xf32>
    %18 = vector.multi_reduction <add>, %17, %cst_11 [0] : vector<8x128xf32> to vector<128xf32>
    %19 = vector.shape_cast %18 : vector<128xf32> to vector<1x128xf32>
    %cst_12 = arith.constant 8.000000e+00 : f32
    %20 = vector.broadcast %cst_12 : f32 to vector<1x128xf32>
    %21 = arith.divf %19, %20 : vector<1x128xf32>
    %cst_13 = arith.constant 9.99999974E-6 : f32
    %22 = vector.broadcast %cst_13 : f32 to vector<1x128xf32>
    %23 = arith.addf %21, %22 : vector<1x128xf32>
    %24 = math.rsqrt %23 : vector<1x128xf32>
    %25 = arith.mulf %4, %24 : vector<1x128xf32>
    %26 = vector.broadcast %25 : vector<1x128xf32> to vector<8x128xf32>
    %27 = arith.mulf %16, %26 : vector<8x128xf32>
    %28 = vector.broadcast %5 : vector<1x128xf32> to vector<8x128xf32>
    %29 = arith.addf %27, %28 : vector<8x128xf32>
    %30 = vector.extract_strided_slice %29 {offsets = [0, 0], sizes = [8, 8], strides = [1, 1]} : vector<8x128xf32> to vector<8x8xf32>
    %c8 = arith.constant 8 : index
    %c0_14 = arith.constant 0 : index
    %31 = vector.load %arg2[%c8, %c0_14] : memref<64x128xf32, #tpu.memory_space<vmem>>, vector<8x128xf32>
    %c3 = arith.constant 3 : index
    %c0_15 = arith.constant 0 : index
    %32 = vector.load %arg3[%c3, %c0_15] : memref<16x128xf32, #tpu.memory_space<vmem>>, vector<1x128xf32>
    %c4 = arith.constant 4 : index
    %c0_16 = arith.constant 0 : index
    %33 = vector.load %arg3[%c4, %c0_16] : memref<16x128xf32, #tpu.memory_space<vmem>>, vector<1x128xf32>
    %c5 = arith.constant 5 : index
    %c0_17 = arith.constant 0 : index
    %34 = vector.load %arg3[%c5, %c0_17] : memref<16x128xf32, #tpu.memory_space<vmem>>, vector<1x128xf32>
    %cst_18 = arith.constant dense<0.000000e+00> : vector<8x128xf32>
    %35 = tpu.matmul %30, %31, %cst_18 {dimension_numbers = #tpu.dot_dimension_numbers<[1], [0], [0], [1], [0, 0, 1, 1], [], []>} : vector<8x8xf32>, vector<8x128xf32>, vector<8x128xf32> -> vector<8x128xf32>
    %36 = vector.broadcast %32 : vector<1x128xf32> to vector<8x128xf32>
    %37 = arith.addf %35, %36 : vector<8x128xf32>
    %cst_19 = arith.constant 0.000000e+00 : f32
    %38 = vector.broadcast %cst_19 : f32 to vector<8x128xf32>
    %39 = arith.maximumf %37, %38 : vector<8x128xf32>
    %cst_20 = arith.constant dense<0.000000e+00> : vector<128xf32>
    %40 = vector.multi_reduction <add>, %39, %cst_20 [0] : vector<8x128xf32> to vector<128xf32>
    %41 = vector.shape_cast %40 : vector<128xf32> to vector<1x128xf32>
    %cst_21 = arith.constant 8.000000e+00 : f32
    %42 = vector.broadcast %cst_21 : f32 to vector<1x128xf32>
    %43 = arith.divf %41, %42 : vector<1x128xf32>
    %44 = vector.broadcast %43 : vector<1x128xf32> to vector<8x128xf32>
    %45 = arith.subf %39, %44 : vector<8x128xf32>
    %46 = arith.mulf %45, %45 : vector<8x128xf32>
    %cst_22 = arith.constant dense<0.000000e+00> : vector<128xf32>
    %47 = vector.multi_reduction <add>, %46, %cst_22 [0] : vector<8x128xf32> to vector<128xf32>
    %48 = vector.shape_cast %47 : vector<128xf32> to vector<1x128xf32>
    %cst_23 = arith.constant 8.000000e+00 : f32
    %49 = vector.broadcast %cst_23 : f32 to vector<1x128xf32>
    %50 = arith.divf %48, %49 : vector<1x128xf32>
    %cst_24 = arith.constant 9.99999974E-6 : f32
    %51 = vector.broadcast %cst_24 : f32 to vector<1x128xf32>
    %52 = arith.addf %50, %51 : vector<1x128xf32>
    %53 = math.rsqrt %52 : vector<1x128xf32>
    %54 = arith.mulf %33, %53 : vector<1x128xf32>
    %55 = vector.broadcast %54 : vector<1x128xf32> to vector<8x128xf32>
    %56 = arith.mulf %45, %55 : vector<8x128xf32>
    %57 = vector.broadcast %34 : vector<1x128xf32> to vector<8x128xf32>
    %58 = arith.addf %56, %57 : vector<8x128xf32>
    %59 = vector.extract_strided_slice %58 {offsets = [0, 0], sizes = [8, 16], strides = [1, 1]} : vector<8x128xf32> to vector<8x16xf32>
    %c16 = arith.constant 16 : index
    %c0_25 = arith.constant 0 : index
    %60 = vector.load %arg2[%c16, %c0_25] : memref<64x128xf32, #tpu.memory_space<vmem>>, vector<16x128xf32>
    %c6 = arith.constant 6 : index
    %c0_26 = arith.constant 0 : index
    %61 = vector.load %arg3[%c6, %c0_26] : memref<16x128xf32, #tpu.memory_space<vmem>>, vector<1x128xf32>
    %c7 = arith.constant 7 : index
    %c0_27 = arith.constant 0 : index
    %62 = vector.load %arg3[%c7, %c0_27] : memref<16x128xf32, #tpu.memory_space<vmem>>, vector<1x128xf32>
    %c8_28 = arith.constant 8 : index
    %c0_29 = arith.constant 0 : index
    %63 = vector.load %arg3[%c8_28, %c0_29] : memref<16x128xf32, #tpu.memory_space<vmem>>, vector<1x128xf32>
    %cst_30 = arith.constant dense<0.000000e+00> : vector<8x128xf32>
    %64 = tpu.matmul %59, %60, %cst_30 {dimension_numbers = #tpu.dot_dimension_numbers<[1], [0], [0], [1], [0, 0, 1, 1], [], []>} : vector<8x16xf32>, vector<16x128xf32>, vector<8x128xf32> -> vector<8x128xf32>
    %65 = vector.broadcast %61 : vector<1x128xf32> to vector<8x128xf32>
    %66 = arith.addf %64, %65 : vector<8x128xf32>
    %cst_31 = arith.constant 0.000000e+00 : f32
    %67 = vector.broadcast %cst_31 : f32 to vector<8x128xf32>
    %68 = arith.maximumf %66, %67 : vector<8x128xf32>
    %cst_32 = arith.constant dense<0.000000e+00> : vector<128xf32>
    %69 = vector.multi_reduction <add>, %68, %cst_32 [0] : vector<8x128xf32> to vector<128xf32>
    %70 = vector.shape_cast %69 : vector<128xf32> to vector<1x128xf32>
    %cst_33 = arith.constant 8.000000e+00 : f32
    %71 = vector.broadcast %cst_33 : f32 to vector<1x128xf32>
    %72 = arith.divf %70, %71 : vector<1x128xf32>
    %73 = vector.broadcast %72 : vector<1x128xf32> to vector<8x128xf32>
    %74 = arith.subf %68, %73 : vector<8x128xf32>
    %75 = arith.mulf %74, %74 : vector<8x128xf32>
    %cst_34 = arith.constant dense<0.000000e+00> : vector<128xf32>
    %76 = vector.multi_reduction <add>, %75, %cst_34 [0] : vector<8x128xf32> to vector<128xf32>
    %77 = vector.shape_cast %76 : vector<128xf32> to vector<1x128xf32>
    %cst_35 = arith.constant 8.000000e+00 : f32
    %78 = vector.broadcast %cst_35 : f32 to vector<1x128xf32>
    %79 = arith.divf %77, %78 : vector<1x128xf32>
    %cst_36 = arith.constant 9.99999974E-6 : f32
    %80 = vector.broadcast %cst_36 : f32 to vector<1x128xf32>
    %81 = arith.addf %79, %80 : vector<1x128xf32>
    %82 = math.rsqrt %81 : vector<1x128xf32>
    %83 = arith.mulf %62, %82 : vector<1x128xf32>
    %84 = vector.broadcast %83 : vector<1x128xf32> to vector<8x128xf32>
    %85 = arith.mulf %74, %84 : vector<8x128xf32>
    %86 = vector.broadcast %63 : vector<1x128xf32> to vector<8x128xf32>
    %87 = arith.addf %85, %86 : vector<8x128xf32>
    %88 = vector.extract_strided_slice %87 {offsets = [0, 0], sizes = [8, 32], strides = [1, 1]} : vector<8x128xf32> to vector<8x32xf32>
    %c32 = arith.constant 32 : index
    %c0_37 = arith.constant 0 : index
    %89 = vector.load %arg2[%c32, %c0_37] : memref<64x128xf32, #tpu.memory_space<vmem>>, vector<32x128xf32>
    %c9 = arith.constant 9 : index
    %c0_38 = arith.constant 0 : index
    %90 = vector.load %arg3[%c9, %c0_38] : memref<16x128xf32, #tpu.memory_space<vmem>>, vector<1x128xf32>
    %cst_39 = arith.constant dense<0.000000e+00> : vector<8x128xf32>
    %91 = tpu.matmul %88, %89, %cst_39 {dimension_numbers = #tpu.dot_dimension_numbers<[1], [0], [0], [1], [0, 0, 1, 1], [], []>} : vector<8x32xf32>, vector<32x128xf32>, vector<8x128xf32> -> vector<8x128xf32>
    %92 = vector.broadcast %90 : vector<1x128xf32> to vector<8x128xf32>
    %93 = arith.addf %91, %92 : vector<8x128xf32>
    %c0_40 = arith.constant 0 : index
    %c0_41 = arith.constant 0 : index
    %c0_42 = arith.constant 0 : index
    %94 = vector.load %arg4[%c0_40, %c0_41, %c0_42] : memref<1x8x128xf32, #tpu.memory_space<vmem>>, vector<1x8x128xf32>
    %95 = vector.shape_cast %94 : vector<1x8x128xf32> to vector<8x128xf32>
    %96 = vector.shape_cast %93 : vector<8x128xf32> to vector<1x8x128xf32>
    tpu.vector_store %arg4[%c0_40, %c0_41, %c0_42], %96 {strides = array<i32>} : memref<1x8x128xf32, #tpu.memory_space<vmem>>, vector<1x8x128xf32>,
    return
  }
  func.func @transform_0(%arg0: i32) -> (i32, i32, i32) {
    %c0_i32 = arith.constant 0 : i32
    %c0_i32_0 = arith.constant 0 : i32
    %c0_i32_1 = arith.constant 0 : i32
    return %arg0, %c0_i32, %c0_i32_0 : i32, i32, i32
  }
  func.func @transform_1(%arg0: i32) -> (i32, i32) {
    %c0_i32 = arith.constant 0 : i32
    %c0_i32_0 = arith.constant 0 : i32
    %c0_i32_1 = arith.constant 0 : i32
    return %c0_i32, %c0_i32_0 : i32, i32
  }
  func.func @transform_2(%arg0: i32) -> (i32, i32) {
    %c0_i32 = arith.constant 0 : i32
    %c0_i32_0 = arith.constant 0 : i32
    %c0_i32_1 = arith.constant 0 : i32
    return %c0_i32, %c0_i32_0 : i32, i32
  }
  func.func @transform_3(%arg0: i32) -> (i32, i32, i32) {
    %c0_i32 = arith.constant 0 : i32
    %c0_i32_0 = arith.constant 0 : i32
    %c0_i32_1 = arith.constant 0 : i32
    return %arg0, %c0_i32, %c0_i32_0 : i32, i32, i32
  }
}

</mosaic_0001>

<bundles_post_ra>
// kernel: tpu_custom_call.1
= control target key start
LH: loop header
LB: loop body
LE: loop exit
PB: predicated region body
PF: predicated region fallthrough
CT: control target
= control target key end

     0   :  { %8 = vsyncpa [#allocation3], 0  ;;  %s1124_s0 = inlined_call_operand.vmem [shape: f32[4,8,4], index: 0, kind: input, shape index: {}]   ;;  %s1125_s1 = inlined_call_operand.hbm [shape: f32[64,128], index: 1, kind: input, shape index: {}]   ;;  %s1126_s2 = inlined_call_operand.vmem [shape: f32[16,128], index: 2, kind: input, shape index: {}]   ;;  %s1127_s3 = inlined_call_operand.hbm [shape: f32[4,8,128], index: 3, kind: output, shape index: {}]  }
   0x1   :  { %9 = vsyncpa [#allocation4], 0 }
   0x2   :  { %11 = vsyncpa [#allocation4 + $0x1], 0  ;;  %s950_s12 = smov 0   ;;  %s952_s13 = smov 0  }
   0x3   :  { %s954_s14 = smov 0   ;;  %s956_s15 = smov 0  }
   0x4 LB: > { %s971_s16 = sadd.s32 4294967295, %s921_s15   ;;  %s693_s17 = sadd.s32 4294967294, %s921_s15   ;;  %s921_s15 = sphi %s956_s15, %s1143_s15   ;;  %s917_s14 = sphi %s954_s14, %s1142_s14   ;;  %s913_s13 = sphi %s952_s13, %s1141_s13   ;;  %s909_s12 = sphi %s950_s12, %s1140_s12  }
   0x5   : > { %s975_s18 = sadd.s32 1, %s921_s15   ;;  %s92_s19 = sadd.s32 1, %s917_s14 }
   0x6   : > { %s89_s20 = ssub.s32 %s921_s15, %s975_s18  ;;  %p102_p0 = scmp.ne.s32.totalorder %s917_s14, %s913_s13 }
   0x7   : > { %p90_p1 = scmp.eq.s32.totalorder %s89_s20, 0  ;;  %p103_p2 = scmp.eq.s32.totalorder %s971_s16, 3 }
   0x8   : > { %p108_p3 = scmp.ne.s32.totalorder %s913_s13, %s909_s12  ;;  %p109_p4 = scmp.eq.s32.totalorder %s693_s17, 3 }
   0x9   : > { %s986_s21 = scalar_select %p90_p1, %s917_s14, %s92_s19  }
   0xa   : > { %p988_p5 = por %p103_p2, %p102_p0  ;;  %p992_p6 = por %p109_p4, %p108_p3 }
   0xb   : > { %p694_p7 = scmp.ge.s32.totalorder %s921_s15, 1  ;;  %p116_p8 = scmp.lt.s32.totalorder %s921_s15, 5 }
   0xc   : > { %s1131_s22 = scalar_select %p988_p5, 1, 0 }
   0xd   : > { %s1132_s23 = scalar_select %p992_p6, 1, 0 }
   0xe   : > { %p1128_p9 = scmp.eq.s32.totalorder %s971_s16, 0  ;;  %p999_p10 = pnand %p694_p7, %p116_p8 }
   0xf   : > { %s923_s25 = smov [#allocation2]   ;;  %s827_s30 = scalar_lea.hbm %s1125_s1, 1024 }
  0x10   : > { %s1133_s24 = scalar_select %p999_p10, 1, 0 }
  0x11   : > { %s128_s26 = sshll.u32 %s923_s25, 4  ;;  %p772_p11 = pneg %p999_p10  ;;  %s129_s26 = int_to_ptr.vmem [resolvable:$true] %s128_s26 }
  0x12   : > { %p828_p13 = scmp.ne.s32.totalorder %s1125_s1, %s827_s30  ;;  %p834_p3 = scmp.lt.u32.totalorder %s827_s30, %s1125_s1 }
  0x13   : > { %p1007_p12 = pnand %p1128_p9, %p772_p11 }
  0x15   : > { %p829_p0 = pneg %p1007_p12 }
  0x17   : > { %p830_p1 = pnand %p829_p0, %p828_p13 }
  0x19   : > { %p831_p2 = pneg %p830_p1 }
  0x1b   : > { %p836_p4 = pnand %p834_p3, %p831_p2 }
  0x1d   : > { %839 = shalt.err (!%p836_p4)
}
  0x1e   : > { %s840_s8 = scalar_lea.vmem %s129_s26, 1024  ;;  %p848_p9 = scmp.lt.s32.totalorder %s129_s26, %s129_s26 }
  0x1f   : > { %p841_p7 = scmp.ne.s32.totalorder %s129_s26, %s840_s8  ;;  %p849_p6 = scmp.lt.s32.totalorder %s840_s8, %s840_s8 }
  0x21   : > { %p843_p8 = pnand %p841_p7, %p829_p0  ;;  %p850_p5 = por %p849_p6, %p848_p9 }
  0x23   : > { %p844_p11 = pneg %p843_p8 }
  0x25   : > { %p851_p10 = pnand %p850_p5, %p844_p11 }
  0x27   : > { %854 = shalt.err (!%p851_p10)
}
  0x28   : > { %s924_s9 = smov 128   ;;  %s925_s10 = smov 8  }
  0x29   : > { %775 = dma.hbm_to_vmem [thread:$0]  (!%p1007_p12), %s1125_s1, 1024, %s129_s26, [#allocation3], %s924_s9, %s924_s9, %s925_s10  }
  0x2a   : > { %p1135_p13 = scmp.ne.s32.totalorder %s1133_s24, 0 }
  0x2b   : > { %p1136_p1 = scmp.eq.s32.totalorder (!%p1135_p13), %s971_s16, 0 }
  0x2c   : > { %154 = sbr.rel (%p1135_p13) target bundleno = 1094 (0x446), region = 32 }
  0x33   : > { %900 = dma.done.wait (%p1136_p1), [#allocation3], 1024   ;;  %p1137_p0 = pmov %p1136_p1 }
  0x34   : > { %p177_p5 = scmp.lt.s32.totalorder %s971_s16, 3  ;;  %v926_v0 = vmov 0.0   ;;  %vm927_vm0 = vmmov 0   ;;  %vm194_vm1 = vcmask 1043456   ;;  %vm190_vm2 = vcmask 31744   ;;  %v299_v3 = vld [vmem:[#allocation2 + $0x8] sm:$0xff] }
  0x35   : > { %902 = vsyncadd (%p1137_p0), [#allocation3], 4294966272  ;;  %729 = vmatprep.subr.mxu0 %v926_v0  ;;  %731 = vmatprep.mubr.msk.f32.mxu0 %vm927_vm0, %v926_v0  ;;  %v182_v1 = vld [vmem:[#allocation2] sm:$0xf]  ;;  %v289_v26 = vlaneseq  ;;  %vm307_vm3 = vcmask 64512   ;;  %v411_v36 = vld [vmem:[#allocation2 + $0x10] sm:$0xff] }
  0x36   : > { %s178_s19 = scalar_select %p177_p5, %s971_s16, 3  ;;  %734 = vmatprep.subr.mxu1 %v926_v0  ;;  %736 = vmatprep.mubr.msk.f32.mxu1 %vm927_vm0, %v926_v0  ;;  %v701_v4 = vld [vmem:[%s1126_s2] ss:$0 sm:$0xff]  ;;  %v184_v28 = vld [vmem:[%s1126_s2 + $0x1] sm:$0x1]  ;;  %v412_v37 = vld [vmem:[#allocation2 + $0x18] sm:$0xff] }
  0x37   : > { %730 = vmatpush3.msk.msra.mxu0 %vm194_vm1, %v182_v1  ;;  %735 = vmatpush3.msra.mxu1 %v299_v3  ;;  %v290_v27 = vshrl.u32 %v289_v26, 7  ;;  %v704_v33 = vld [vmem:[%s1126_s2 + $0x2] ss:$0 sm:$0xff]  ;;  %v758_v38 = vpack.c.bf16 %v412_v37, %v411_v36  ;;  %v928_v39 = vmov 0.0|0.0   ;;  %v705_v40 = vld [vmem:[%s1126_s2 + $0x3] ss:$0 sm:$0xff] }
  0x38   : > { %s700_s20 = sshll.u32 %s178_s19, 3  ;;  %757 = vmatprep.subr.bf16.mxu0 %v928_v39  ;;  %760 = vmatprep.subr.bf16.mxu1 %v928_v39  ;;  %v301_v62 = vld [vmem:[%s1126_s2 + $0x4] sm:$0x1]  ;;  %vm420_vm4 = vcmask 130048   ;;  %vm533_vm5 = vcmask 261120   ;;  %s174_s27 = sand.u32 1, %s913_s13  }
  0x39   : > { %s180_s26 = scalar_lea.vmem %s1124_s0, %s700_s20  ;;  %v1047_v29 = vsub.s32 0, %v290_v27  ;;  %s699_s28 = sshll.u32 %s174_s27, 3 }
  0x3a   : > { %v181_v2 = vld [vmem:[%s180_s26] sm:$0xff]  ;;  %s714_s4 = sshll.u32 %s971_s16, 7  ;;  %s176_s5 = scalar_lea.vmem [#allocation5], %s699_s28 }
  0x3b   : > { %732 = vmatmul.mubr.msk.f32.vlgmr.msra.gmra.mrb[0].mxu0 %vm190_vm2, %v181_v2  ;;  %v707_v2 = vld [vmem:[%s1126_s2 + $0x5] ss:$0 sm:$0xff]  ;;  %s622_s6 = sshll.u32 %s176_s5, 4  ;;  %s1082_s9 = scalar_lea.hbm %s1127_s3, %s714_s4  ;;  %s1084_s6 = int_to_ptr.vmem [resolvable:$true] %s622_s6 }
  0x3c   : > { %743 = vmatprep.mubr.msk.f32.mxu0 %vm927_vm0, %v926_v0  ;;  %759 = vmatpush3.bf16.msra.mxu0 %v758_v38  ;;  %v710_v38 = vld [vmem:[%s1126_s2 + $0x8] ss:$0 sm:$0xff]  ;;  %s609_s10 = scalar_lea.sflag [#allocation4], %s174_s27  ;;  %s855_s11 = scalar_lea.vmem %s1084_s6, 128 }
  0x3d   : > { %p856_p6 = scmp.ne.s32.totalorder %s1084_s6, %s855_s11  ;;  %p1138_p9 = scmp.ne.s32.totalorder %s1131_s22, 0 }
  0x3e   : > { %s929_s16 = smov [#allocation5]  }
  0x3f   : > { %p857_p10 = pnand %p856_p6, %p1138_p9  ;;  %s859_s17 = sshll.u32 %s929_s16, 4  ;;  %s860_s17 = int_to_ptr.vmem [resolvable:$false] %s859_s17 }
  0x40   : > { %s861_s19 = scalar_lea.vmem %s860_s17, 256  ;;  %p862_p2 = scmp.lt.s32.totalorder %s1084_s6, %s860_s17 }
  0x41   : > { %p858_p12 = pneg %p857_p10  ;;  %p863_p3 = scmp.lt.s32.totalorder %s861_s19, %s855_s11 }
  0x43   : > { %p864_p4 = por %p863_p3, %p862_p2 }
  0x45   : > { %p865_p7 = pnand %p864_p4, %p858_p12 }
 0x10e   : > { %v264_v5 = vpop.f32.mrb[0].mxu0 }
 0x10f   : > { %v265_v6 = vadd.f32 %v701_v4, %v264_v5  ;;  %v733_v7 = vpop.f32.mrb[1].mxu0  ;;  %v524_v5 = vld [vmem:[#allocation2 + $0x20] sm:$0xff] }
 0x111   : > { %v268_v8 = vmax.f32 %v265_v6, 0.0  ;;  %v525_v6 = vld [vmem:[#allocation2 + $0x28] sm:$0xff] }
 0x112   : > { %v761_v7 = vpack.c.bf16 %v525_v6, %v524_v5 }
 0x113   : > { %v269_v9 = vrot.slane %v268_v8, 4 }
 0x115   : > { %v270_v10 = vadd.f32 %v269_v9, %v268_v8  ;;  %v527_v9 = vld [vmem:[#allocation2 + $0x38] sm:$0xff] }
 0x117   : > { %v271_v11 = vrot.slane %v270_v10, 2 }
 0x119   : > { %v272_v12 = vadd.f32 %v271_v11, %v270_v10  ;;  %v708_v11 = vld [vmem:[%s1126_s2 + $0x6] ss:$0 sm:$0xff] }
 0x11b   : > { %v273_v13 = vrot.slane %v272_v12, 1 }
 0x11d   : > { %v274_v14 = vadd.f32 %v273_v13, %v272_v12 }
 0x11f   : > { %v276_v15 = vmul.f32 0.125, %v274_v14 }
 0x121   : > { %v277_v16 = vsub.f32 %v268_v8, %v276_v15  ;;  %v526_v8 = vld [vmem:[#allocation2 + $0x30] sm:$0xff] }
 0x122   : > { %v764_v10 = vpack.c.bf16 %v527_v9, %v526_v8 }
 0x123   : > { %v278_v17 = vmul.f32 %v277_v16, %v277_v16 }
 0x125   : > { %v279_v18 = vrot.slane %v278_v17, 4 }
 0x127   : > { %v280_v19 = vadd.f32 %v279_v18, %v278_v17 }
 0x129   : > { %v281_v20 = vrot.slane %v280_v19, 2 }
 0x12b   : > { %v282_v21 = vadd.f32 %v281_v20, %v280_v19 }
 0x12d   : > { %v283_v22 = vrot.slane %v282_v21, 1 }
 0x12f   : > { %v284_v23 = vadd.f32 %v283_v22, %v282_v21 }
 0x131   : > { %v285_v24 = vmul.f32 0.125, %v284_v23 }
 0x133   : > { %v286_v25 = vadd.f32 1e-05, %v285_v24 }
 0x135   : > { %821 = vrsqrt.f32 %v286_v25 }
 0x13f   : > { %v822_v30 = vpop.eup %821 }
 0x140   : > { %v288_v31 = vmul.f32 %v822_v30, %v184_v28 }
 0x142   : > { %v292_v32 = vrot.slane %v288_v31, %v1047_v29 }
 0x144   : > { %v293_v34 = vmul.f32 %v292_v32, %v277_v16 }
 0x146   : > { %v298_v35 = vadd.f32 %v704_v33, %v293_v34  ;;  %v414_v34 = vld [vmem:[%s1126_s2 + $0x7] sm:$0x1] }
 0x148   : > { %737 = vmatmul.mubr.msk.f32.vlgmr.msra.gmra.mrb[0].mxu1 %vm307_vm3, %v298_v35 }
 0x149   : > { %754 = vmatprep.mubr.msk.f32.mxu1 %vm927_vm0, %v926_v0  ;;  %762 = vmatpush3.bf16.msra.mxu1 %v761_v7 }
 0x14a   : > { %763 = vmatprep.subr.bf16.mxu1 %v928_v39 }
 0x14d   : > { %765 = vmatpush3.bf16.msra.mxu1 %v764_v10 }
 0x21b   : > { %v377_v41 = vpop.f32.mrb[0].mxu1 }
 0x21c   : > { %v378_v42 = vadd.f32 %v705_v40, %v377_v41  ;;  %v738_v43 = vpop.f32.mrb[1].mxu1  ;;  %v711_v41 = vld [vmem:[%s1126_s2 + $0x9] ss:$0 sm:$0xff] }
 0x21e   : > { %v381_v44 = vmax.f32 %v378_v42, 0.0 }
 0x220   : > { %v382_v45 = vrot.slane %v381_v44, 4 }
 0x222   : > { %v383_v46 = vadd.f32 %v382_v45, %v381_v44 }
 0x224   : > { %v384_v47 = vrot.slane %v383_v46, 2 }
 0x226   : > { %v385_v48 = vadd.f32 %v384_v47, %v383_v46 }
 0x228   : > { %v386_v49 = vrot.slane %v385_v48, 1 }
 0x22a   : > { %v387_v50 = vadd.f32 %v386_v49, %v385_v48 }
 0x22c   : > { %v388_v51 = vmul.f32 0.125, %v387_v50 }
 0x22e   : > { %v389_v52 = vsub.f32 %v381_v44, %v388_v51 }
 0x230   : > { %v390_v53 = vmul.f32 %v389_v52, %v389_v52 }
 0x232   : > { %v391_v54 = vrot.slane %v390_v53, 4 }
 0x234   : > { %v392_v55 = vadd.f32 %v391_v54, %v390_v53 }
 0x236   : > { %v393_v56 = vrot.slane %v392_v55, 2 }
 0x238   : > { %v394_v57 = vadd.f32 %v393_v56, %v392_v55 }
 0x23a   : > { %v395_v58 = vrot.slane %v394_v57, 1 }
 0x23c   : > { %v396_v59 = vadd.f32 %v395_v58, %v394_v57 }
 0x23e   : > { %v397_v60 = vmul.f32 0.125, %v396_v59 }
 0x240   : > { %v398_v61 = vadd.f32 1e-05, %v397_v60 }
 0x242   : > { %823 = vrsqrt.f32 %v398_v61 }
 0x24c   : > { %v824_v63 = vpop.eup %823 }
 0x24d   : > { %v400_v0 = vmul.f32 %v824_v63, %v301_v62 }
 0x24f   : > { %v404_v1 = vrot.slane %v400_v0, %v1047_v29 }
 0x251   : > { %v405_v3 = vmul.f32 %v404_v1, %v389_v52 }
 0x253   : > { %v410_v4 = vadd.f32 %v707_v2, %v405_v3 }
 0x255   : > { %744 = vmatmul.mubr.msk.f32.vlgmr.msra.gmra.mrb[2].mxu0 %vm420_vm4, %v410_v4 }
 0x328   : > { %v490_v12 = vpop.f32.mrb[2].mxu0 }
 0x329   : > { %v491_v13 = vadd.f32 %v708_v11, %v490_v12  ;;  %v745_v14 = vpop.f32.mrb[3].mxu0 }
 0x32b   : > { %v494_v15 = vmax.f32 %v491_v13, 0.0 }
 0x32d   : > { %v495_v16 = vrot.slane %v494_v15, 4 }
 0x32f   : > { %v496_v17 = vadd.f32 %v495_v16, %v494_v15 }
 0x331   : > { %v497_v18 = vrot.slane %v496_v17, 2 }
 0x333   : > { %v498_v19 = vadd.f32 %v497_v18, %v496_v17 }
 0x335   : > { %v499_v20 = vrot.slane %v498_v19, 1 }
 0x337   : > { %v500_v21 = vadd.f32 %v499_v20, %v498_v19 }
 0x339   : > { %v501_v22 = vmul.f32 0.125, %v500_v21 }
 0x33b   : > { %v502_v23 = vsub.f32 %v494_v15, %v501_v22 }
 0x33d   : > { %v503_v24 = vmul.f32 %v502_v23, %v502_v23 }
 0x33f   : > { %v504_v25 = vrot.slane %v503_v24, 4 }
 0x341   : > { %v505_v26 = vadd.f32 %v504_v25, %v503_v24 }
 0x343   : > { %v506_v27 = vrot.slane %v505_v26, 2 }
 0x345   : > { %v507_v28 = vadd.f32 %v506_v27, %v505_v26 }
 0x347   : > { %v508_v30 = vrot.slane %v507_v28, 1 }
 0x349   : > { %v509_v31 = vadd.f32 %v508_v30, %v507_v28 }
 0x34b   : > { %v510_v32 = vmul.f32 0.125, %v509_v31 }
 0x34d   : > { %v511_v33 = vadd.f32 1e-05, %v510_v32 }
 0x34f   : > { %825 = vrsqrt.f32 %v511_v33 }
 0x359   : > { %v826_v35 = vpop.eup %825 }
 0x35a   : > { %v513_v36 = vmul.f32 %v826_v35, %v414_v34 }
 0x35c   : > { %v517_v37 = vrot.slane %v513_v36, %v1047_v29 }
 0x35e   : > { %v518_v39 = vmul.f32 %v517_v37, %v502_v23 }
 0x360   : > { %v523_v40 = vadd.f32 %v710_v38, %v518_v39 }
 0x362   : > { %755 = vmatmul.mubr.msk.f32.vlgmr.msra.gmra.mrb[2].mxu1 %vm533_vm5, %v523_v40 }
 0x435   : > { %v603_v42 = vpop.f32.mrb[2].mxu1 }
 0x436   : > { %v604_v29 = vadd.f32 %v711_v41, %v603_v42  ;;  %v756_v43 = vpop.f32.mrb[3].mxu1 }
 0x438   : > { %607 = vst [vmem:[%s176_s5] sm:$0xff] %v604_v29 }
 0x439   : > { %868 = shalt.err (!%p865_p7)
}
 0x43a   : > { %s869_s20 = scalar_lea.hbm %s1082_s9, 128  ;;  %s873_s26 = scalar_lea.hbm %s1127_s3, 512 }
 0x43b   : > { %p870_p8 = scmp.ne.s32.totalorder %s1082_s9, %s869_s20  ;;  %p874_p1 = scmp.lt.u32.totalorder %s1082_s9, %s1127_s3 }
 0x43c   : > { %p875_p0 = scmp.lt.u32.totalorder %s873_s26, %s869_s20  ;;  %p877_p6 = scmp.lt.u32.totalorder %s869_s20, %s1082_s9 }
 0x43d   : > { %p871_p11 = pnand %p870_p8, %p1138_p9 }
 0x43e   : > { %p876_p5 = por %p875_p0, %p874_p1 }
 0x43f   : > { %p872_p13 = pneg %p871_p11 }
 0x440   : > { %p878_p10 = por %p877_p6, %p876_p5 }
 0x442   : > { %p879_p12 = pnand %p878_p10, %p872_p13 }
 0x444   : > { %882 = shalt.err (!%p879_p12)
}
 0x445   : > { %770 = dma.vmem_to_hbm [thread:$0]  (%p1138_p9), %s1084_s6, 128, %s1082_s9, %s609_s10  }
 0x446 PF: > { %p782_p2 = scmp.ge.s32.totalorder %s921_s15, 2  ;;  %s634_s29 = sand.u32 1, %s909_s12  }
 0x447   : > { %p1139_p3 = scmp.ne.s32.totalorder %s1132_s23, 0  ;;  %s635_s30 = scalar_lea.sflag [#allocation4], %s634_s29 }
 0x449   : > { %p777_p4 = pnand %p782_p2, %p1139_p3 }
 0x44b   : > { %904 = dma.done.wait (!%p777_p4), %s635_s30, 128  }
 0x44c   : > { %906 = vsyncadd (!%p777_p4), %s635_s30, 4294967168  ;;  %p14_p7 = scmp.ge.s32.totalorder %s975_s18, 6   ;;  %s1140_s12 = smov %s913_s13 }
 0x44d   : > { %s1141_s13 = smov %s917_s14  ;;  %s1142_s14 = smov %s986_s21 }
 0x44e   : > { %s1143_s15 = smov %s975_s18  ;;  %16 = sbr.rel (!%p14_p7) target bundleno = 4 (0x4), region = 72 }
 0x455   :  { %640 = vsyncpa [#allocation3], 1 }
 0x456   :  { %642 = vsyncpa [#allocation3 + $0x1], 1 }
 0x457   :  { %643 = vsyncpa [#allocation4], 1 }
 0x458   :  { %645 = vsyncpa [#allocation4 + $0x1], 1 }

</bundles_post_ra>
